<compile_context>
chip_gen: v6e
topology: v6e:2x2x1
jax: 0.10.0
libtpu: 0.0.40
codegen_flags: <defaults>
</compile_context>

<pallas_src>
import math

import jax
import jax.numpy as jnp
from jax.experimental import pallas as pl
from jax.experimental.pallas import tpu as pltpu


def _swiglu_ffn_kernel(x_ref, w1_ref, w3_ref, w2_ref, o_ref, acc_ref):
    """One (row-tile, hidden-tile) step of  out = (silu(x@w1) * (x@w3)) @ w2."""
    h = pl.program_id(1)

    @pl.when(h == 0)
    def _():
        acc_ref[...] = jnp.zeros_like(acc_ref)

    x = x_ref[...]                                                     # (tm, dim)
    g = jnp.dot(x, w1_ref[...], preferred_element_type=jnp.float32)    # (tm, th)
    u = jnp.dot(x, w3_ref[...], preferred_element_type=jnp.float32)    # (tm, th)
    # SiLU(g) * u in f32.  exp -> EUP, approx reciprocal -> EUP (free slots);
    # the matmuls keep the MXU as the binding unit.
    act = g * pl.reciprocal(1.0 + jnp.exp(-g), approx=True) * u
    acc_ref[...] += jnp.dot(act.astype(w2_ref.dtype), w2_ref[...],
                            preferred_element_type=jnp.float32)        # (tm, dim)

    @pl.when(h == pl.num_programs(1) - 1)
    def _():
        o_ref[...] = acc_ref[...].astype(o_ref.dtype)


def _round_up(a, b):
    return (a + b - 1) // b * b


def _pick_hidden_tile(hidden, dim, tm, itemsize, budget):
    """Largest lane-aligned (multiple of 128) divisor of `hidden` whose
    double-buffered pipeline plan fits the VMEM budget."""
    cands = sorted(
        (c for c in range(128, hidden + 1, 128) if hidden % c == 0),
        reverse=True,
    )
    if not cands:
        return hidden  # small / odd hidden: take the full extent (still valid)

    def vmem_estimate(th):
        # Double-buffered tiles: x, w1^T, w3^T, w2^T, out  +  f32 accumulator.
        tiles = tm * dim + 2 * dim * th + th * dim + tm * dim
        return 2 * tiles * itemsize + tm * dim * 4

    for th in cands:
        if vmem_estimate(th) <= budget:
            return th
    return cands[-1]


def feed_forward(x, w1, w2, w3, *, block_rows=256, block_hidden=None,
                 vmem_limit_bytes=48 * 1024 * 1024):
    """SwiGLU FFN matching torch:  w2(F.silu(w1(x)) * w3(x)).

    Weights use the PyTorch nn.Linear layout:
      w1: (hidden, dim), w3: (hidden, dim), w2: (dim, hidden).
    """
    orig_shape = x.shape
    dim = orig_shape[-1]
    hidden = w1.shape[0]
    assert w1.shape == (hidden, dim)
    assert w3.shape == (hidden, dim)
    assert w2.shape == (dim, hidden)

    out_dtype = jnp.promote_types(x.dtype, w1.dtype)
    itemsize = jnp.dtype(out_dtype).itemsize

    x2d = x.reshape(-1, dim)
    rows = x2d.shape[0]

    # Sublane-aligned row tile (8 for 32-bit, 16 for 16-bit dtypes); pad rows.
    sublane = 16 if jnp.dtype(x.dtype).itemsize == 2 else 8
    tm = min(block_rows, _round_up(rows, sublane))
    tm = _round_up(tm, sublane)
    rows_p = _round_up(rows, tm)
    if rows_p != rows:
        x2d = jnp.pad(x2d, ((0, rows_p - rows), (0, 0)))

    # Hidden tile: lane-aligned divisor of hidden sized against the VMEM budget.
    if block_hidden is None:
        th = _pick_hidden_tile(hidden, dim, tm, itemsize, vmem_limit_bytes)
    else:
        th = block_hidden
    assert hidden % th == 0, "block_hidden must divide hidden"

    # Matmul-friendly (K, N) weight layouts.  In a real model these would be
    # pre-transposed once at weight-load time instead of per call.
    w1t = jnp.asarray(w1).T      # (dim, hidden)
    w3t = jnp.asarray(w3).T      # (dim, hidden)
    w2t = jnp.asarray(w2).T      # (hidden, dim)

    grid = (rows_p // tm, hidden // th)

    out = pl.pallas_call(
        _swiglu_ffn_kernel,
        out_shape=jax.ShapeDtypeStruct((rows_p, dim), out_dtype),
        grid_spec=pltpu.PrefetchScalarGridSpec(
            num_scalar_prefetch=0,
            grid=grid,
            in_specs=[
                pl.BlockSpec((tm, dim), lambda i, h: (i, 0)),   # x row tile
                pl.BlockSpec((dim, th), lambda i, h: (0, h)),   # w1^T hidden slice
                pl.BlockSpec((dim, th), lambda i, h: (0, h)),   # w3^T hidden slice
                pl.BlockSpec((th, dim), lambda i, h: (h, 0)),   # w2^T hidden slice
            ],
            out_specs=pl.BlockSpec((tm, dim), lambda i, h: (i, 0)),
            scratch_shapes=[pltpu.VMEM((tm, dim), jnp.float32)],
        ),
        compiler_params=pltpu.CompilerParams(
            dimension_semantics=("parallel", "arbitrary"),
            vmem_limit_bytes=vmem_limit_bytes,
        ),
    )(x2d, w1t, w3t, w2t)

    if rows_p != rows:
        out = out[:rows]
    return out.reshape(orig_shape[:-1] + (dim,))


if __name__ == "__main__":
    key = jax.random.PRNGKey(0)
    k_x, k1, k2, k3 = jax.random.split(key, 4)

    # Small shapes consistent with FeedForward(dim, hidden_dim, multiple_of).
    batch, seq, dim = 2, 8, 64
    hidden_dim_arg, multiple_of = 128, 32
    hidden_dim = int(2 * hidden_dim_arg / 3)
    hidden_dim = multiple_of * ((hidden_dim + multiple_of - 1) // multiple_of)  # -> 96

    x = jax.random.normal(k_x, (batch, seq, dim), dtype=jnp.float32)
    s1 = 1.0 / math.sqrt(dim)
    s2 = 1.0 / math.sqrt(hidden_dim)
    w1 = jax.random.uniform(k1, (hidden_dim, dim), jnp.float32, -s1, s1)
    w3 = jax.random.uniform(k3, (hidden_dim, dim), jnp.float32, -s1, s1)
    w2 = jax.random.uniform(k2, (dim, hidden_dim), jnp.float32, -s2, s2)

    out = feed_forward(x, w1, w2, w3)
    jax.block_until_ready(out)

    # Pure-JAX reference matching torch: w2(silu(w1(x)) * w3(x)).
    h = x @ w1.T
    ref = (h * jax.nn.sigmoid(h) * (x @ w3.T)) @ w2.T
    # Tolerance covers default-precision MXU matmuls and the approx reciprocal.
    assert jnp.allclose(out, ref, atol=1e-2, rtol=1e-2), "mismatch vs reference"

    print("KERNEL_OK")
</pallas_src>

<mosaic_0001>
module attributes {stable_mosaic.version = 11 : i64} {
  func.func @_swiglu_ffn_kernel(%arg0: i32, %arg1: i32, %arg2: memref<16x64xf32, #tpu.memory_space<vmem>>, %arg3: memref<64x96xf32, #tpu.memory_space<vmem>>, %arg4: memref<64x96xf32, #tpu.memory_space<vmem>>, %arg5: memref<96x64xf32, #tpu.memory_space<vmem>>, %arg6: memref<16x64xf32, #tpu.memory_space<vmem>>, %arg7: memref<16x64xf32, #tpu.memory_space<vmem>>) attributes {dimension_semantics = [#tpu.dimension_semantics<parallel>, #tpu.dimension_semantics<arbitrary>], iteration_bounds = array<i64: 1, 1>, scalar_prefetch = 0 : i64, scratch_operands = 1 : i64, tpu.core_type = #tpu.core_type<tc>, window_params = [{transform_indices = @transform_0, window_bounds = array<i64: 16, 64>}, {transform_indices = @transform_1, window_bounds = array<i64: 64, 96>}, {transform_indices = @transform_2, window_bounds = array<i64: 64, 96>}, {transform_indices = @transform_3, window_bounds = array<i64: 96, 64>}, {transform_indices = @transform_4, window_bounds = array<i64: 16, 64>}]} {
    %c0_i32 = arith.constant 0 : i32
    %0 = arith.cmpi eq, %arg1, %c0_i32 : i32
    %1 = arith.extui %0 : i1 to i32
    %c0_i32_0 = arith.constant 0 : i32
    %2 = arith.cmpi ne, %1, %c0_i32_0 : i32
    scf.if %2 {
      %cst_18 = arith.constant 0.000000e+00 : f32
      %24 = vector.broadcast %cst_18 : f32 to vector<16x64xf32>
      %c0_19 = arith.constant 0 : index
      %c0_20 = arith.constant 0 : index
      %25 = vector.load %arg7[%c0_19, %c0_20] : memref<16x64xf32, #tpu.memory_space<vmem>>, vector<16x64xf32>
      tpu.vector_store %arg7[%c0_19, %c0_20], %24 {strides = array<i32>} : memref<16x64xf32, #tpu.memory_space<vmem>>, vector<16x64xf32>,
    } else {
    }
    %c0 = arith.constant 0 : index
    %c0_1 = arith.constant 0 : index
    %3 = vector.load %arg2[%c0, %c0_1] : memref<16x64xf32, #tpu.memory_space<vmem>>, vector<16x64xf32>
    %c0_2 = arith.constant 0 : index
    %c0_3 = arith.constant 0 : index
    %4 = vector.load %arg3[%c0_2, %c0_3] : memref<64x96xf32, #tpu.memory_space<vmem>>, vector<64x96xf32>
    %cst = arith.constant dense<0.000000e+00> : vector<16x96xf32>
    %5 = tpu.matmul %3, %4, %cst {dimension_numbers = #tpu.dot_dimension_numbers<[1], [0], [0], [1], [0, 0, 1, 1], [], []>} : vector<16x64xf32>, vector<64x96xf32>, vector<16x96xf32> -> vector<16x96xf32>
    %c0_4 = arith.constant 0 : index
    %c0_5 = arith.constant 0 : index
    %6 = vector.load %arg4[%c0_4, %c0_5] : memref<64x96xf32, #tpu.memory_space<vmem>>, vector<64x96xf32>
    %cst_6 = arith.constant dense<0.000000e+00> : vector<16x96xf32>
    %7 = tpu.matmul %3, %6, %cst_6 {dimension_numbers = #tpu.dot_dimension_numbers<[1], [0], [0], [1], [0, 0, 1, 1], [], []>} : vector<16x64xf32>, vector<64x96xf32>, vector<16x96xf32> -> vector<16x96xf32>
    %cst_7 = arith.constant 0.000000e+00 : f32
    %8 = vector.broadcast %cst_7 : f32 to vector<16x96xf32>
    %9 = arith.subf %8, %5 : vector<16x96xf32>
    %10 = math.exp %9 : vector<16x96xf32>
    %cst_8 = arith.constant 1.000000e+00 : f32
    %11 = vector.broadcast %cst_8 : f32 to vector<16x96xf32>
    %12 = arith.addf %11, %10 : vector<16x96xf32>
    %13 = tpu.reciprocal %12 {approx = true} : vector<16x96xf32> -> vector<16x96xf32>
    %14 = arith.mulf %5, %13 : vector<16x96xf32>
    %15 = arith.mulf %14, %7 : vector<16x96xf32>
    %c0_9 = arith.constant 0 : index
    %c0_10 = arith.constant 0 : index
    %16 = vector.load %arg7[%c0_9, %c0_10] : memref<16x64xf32, #tpu.memory_space<vmem>>, vector<16x64xf32>
    %c0_11 = arith.constant 0 : index
    %c0_12 = arith.constant 0 : index
    %17 = vector.load %arg5[%c0_11, %c0_12] : memref<96x64xf32, #tpu.memory_space<vmem>>, vector<96x64xf32>
    %cst_13 = arith.constant dense<0.000000e+00> : vector<16x64xf32>
    %18 = tpu.matmul %15, %17, %cst_13 {dimension_numbers = #tpu.dot_dimension_numbers<[1], [0], [0], [1], [0, 0, 1, 1], [], []>} : vector<16x96xf32>, vector<96x64xf32>, vector<16x64xf32> -> vector<16x64xf32>
    %19 = arith.addf %16, %18 : vector<16x64xf32>
    %c0_14 = arith.constant 0 : index
    %c0_15 = arith.constant 0 : index
    %20 = vector.load %arg7[%c0_14, %c0_15] : memref<16x64xf32, #tpu.memory_space<vmem>>, vector<16x64xf32>
    tpu.vector_store %arg7[%c0_14, %c0_15], %19 {strides = array<i32>} : memref<16x64xf32, #tpu.memory_space<vmem>>, vector<16x64xf32>,
    %c0_i32_16 = arith.constant 0 : i32
    %21 = arith.cmpi eq, %arg1, %c0_i32_16 : i32
    %22 = arith.extui %21 : i1 to i32
    %c0_i32_17 = arith.constant 0 : i32
    %23 = arith.cmpi ne, %22, %c0_i32_17 : i32
    scf.if %23 {
      %c0_18 = arith.constant 0 : index
      %c0_19 = arith.constant 0 : index
      %24 = vector.load %arg7[%c0_18, %c0_19] : memref<16x64xf32, #tpu.memory_space<vmem>>, vector<16x64xf32>
      %c0_20 = arith.constant 0 : index
      %c0_21 = arith.constant 0 : index
      %25 = vector.load %arg6[%c0_20, %c0_21] : memref<16x64xf32, #tpu.memory_space<vmem>>, vector<16x64xf32>
      tpu.vector_store %arg6[%c0_20, %c0_21], %24 {strides = array<i32>} : memref<16x64xf32, #tpu.memory_space<vmem>>, vector<16x64xf32>,
    } else {
    }
    return
  }
  func.func @transform_0(%arg0: i32, %arg1: i32) -> (i32, i32) {
    %c0_i32 = arith.constant 0 : i32
    %c0_i32_0 = arith.constant 0 : i32
    return %arg0, %c0_i32 : i32, i32
  }
  func.func @transform_1(%arg0: i32, %arg1: i32) -> (i32, i32) {
    %c0_i32 = arith.constant 0 : i32
    %c0_i32_0 = arith.constant 0 : i32
    return %c0_i32, %arg1 : i32, i32
  }
  func.func @transform_2(%arg0: i32, %arg1: i32) -> (i32, i32) {
    %c0_i32 = arith.constant 0 : i32
    %c0_i32_0 = arith.constant 0 : i32
    return %c0_i32, %arg1 : i32, i32
  }
  func.func @transform_3(%arg0: i32, %arg1: i32) -> (i32, i32) {
    %c0_i32 = arith.constant 0 : i32
    %c0_i32_0 = arith.constant 0 : i32
    return %arg1, %c0_i32 : i32, i32
  }
  func.func @transform_4(%arg0: i32, %arg1: i32) -> (i32, i32) {
    %c0_i32 = arith.constant 0 : i32
    %c0_i32_0 = arith.constant 0 : i32
    return %arg0, %c0_i32 : i32, i32
  }
}

</mosaic_0001>

<bundles_post_ra>
// kernel: tpu_custom_call.1
= control target key start
LH: loop header
LB: loop body
LE: loop exit
PB: predicated region body
PF: predicated region fallthrough
CT: control target
= control target key end

     0   :  { %vm22_vm0 = vcmask 523264   ;;  %s608_s0 = inlined_call_operand.vmem [shape: f32[16,64], index: 0, kind: input, shape index: {}]   ;;  %s609_s1 = inlined_call_operand.vmem [shape: f32[64,96], index: 1, kind: input, shape index: {}]   ;;  %s610_s2 = inlined_call_operand.vmem [shape: f32[64,96], index: 2, kind: input, shape index: {}]   ;;  %s611_s3 = inlined_call_operand.vmem [shape: f32[96,64], index: 3, kind: input, shape index: {}]   ;;  %s612_s4 = inlined_call_operand.hbm [shape: f32[16,64], index: 4, kind: output, shape index: {}]  }
   0x1   :  { %v34_v0 = vld [vmem:[%s609_s1 + $0x38] sm:$0xff]  ;;  %v33_v1 = vld [vmem:[%s609_s1 + $0x30] sm:$0xff]  ;;  %v32_v2 = vld [vmem:[%s609_s1 + $0x28] sm:$0xff] }
   0x2   :  { %377 = vmatprep.subr.mxu1 %v34_v0  ;;  %v25_v3 = vld [vmem:[%s608_s0] sm:$0xff]  ;;  %v30_v5 = vld [vmem:[%s609_s1 + $0x18] sm:$0xff] }
   0x3   :  { %378 = vmatpush3.msra.mxu1 %v34_v0  ;;  %393 = vmatprep.mubr.msk.f32.mxu1 %vm22_vm0, %v25_v3  ;;  %v31_v4 = vld [vmem:[%s609_s1 + $0x20] sm:$0xff] }
   0x4   :  { %379 = vmatprep.subr.mxu1 %v33_v1 }
   0x5   :  { %380 = vmatpush3.msra.mxu1 %v33_v1 }
   0x6   :  { %381 = vmatprep.subr.mxu1 %v32_v2 }
   0x7   :  { %382 = vmatpush3.msra.mxu1 %v32_v2 }
   0x8   :  { %9 = vsyncpa [#allocation4], 0  ;;  %383 = vmatprep.subr.mxu1 %v31_v4  ;;  %v29_v6 = vld [vmem:[%s609_s1 + $0x10] sm:$0xff]  ;;  %v28_v7 = vld [vmem:[%s609_s1 + $0x8] sm:$0xff]  ;;  %v476_v30 = vmov 0.0   ;;  %vm228_vm1 = vcmask 785408  }
   0x9   :  { %384 = vmatpush3.msra.mxu1 %v31_v4  ;;  %v27_v8 = vld [vmem:[%s609_s1] sm:$0xff]  ;;  %v26_v9 = vld [vmem:[%s608_s0 + $0x8] sm:$0xff]  ;;  %v124_v10 = vld [vmem:[%s610_s2 + $0x38] sm:$0xff]  ;;  %24 = vst.msk [vmem:[#allocation2 + $0x8] sm:$0xff] %vm22_vm0, %v476_v30 }
   0xa   :  { %385 = vmatprep.subr.mxu1 %v30_v5  ;;  %v123_v11 = vld [vmem:[%s610_s2 + $0x30] sm:$0xff]  ;;  %v122_v12 = vld [vmem:[%s610_s2 + $0x28] sm:$0xff]  ;;  %v121_v13 = vld [vmem:[%s610_s2 + $0x20] sm:$0xff]  ;;  %23 = vst.msk [vmem:[#allocation2] sm:$0xff] %vm22_vm0, %v476_v30 }
   0xb   :  { %386 = vmatpush3.msra.mxu1 %v30_v5  ;;  %v120_v14 = vld [vmem:[%s610_s2 + $0x18] sm:$0xff]  ;;  %v119_v15 = vld [vmem:[%s610_s2 + $0x10] sm:$0xff]  ;;  %v118_v16 = vld [vmem:[%s610_s2 + $0x8] sm:$0xff] }
   0xc   :  { %387 = vmatprep.subr.mxu1 %v29_v6  ;;  %v117_v17 = vld [vmem:[%s610_s2] sm:$0xff]  ;;  %v227_v18 = vld [vmem:[%s611_s3 + $0x58] sm:$0xff]  ;;  %v226_v19 = vld [vmem:[%s611_s3 + $0x50] sm:$0xff] }
   0xd   :  { %388 = vmatpush3.msra.mxu1 %v29_v6  ;;  %415 = vmatprep.subr.mxu0 %v227_v18  ;;  %v225_v20 = vld [vmem:[%s611_s3 + $0x48] sm:$0xff]  ;;  %v224_v21 = vld [vmem:[%s611_s3 + $0x40] sm:$0xff]  ;;  %v223_v22 = vld [vmem:[%s611_s3 + $0x38] sm:$0xff] }
   0xe   :  { %389 = vmatprep.subr.mxu1 %v28_v7  ;;  %416 = vmatpush3.msra.mxu0 %v227_v18  ;;  %v222_v23 = vld [vmem:[%s611_s3 + $0x30] sm:$0xff]  ;;  %v221_v24 = vld [vmem:[%s611_s3 + $0x28] sm:$0xff]  ;;  %v220_v25 = vld [vmem:[%s611_s3 + $0x20] sm:$0xff] }
   0xf   :  { %390 = vmatpush3.msra.mxu1 %v28_v7  ;;  %417 = vmatprep.subr.mxu0 %v226_v19  ;;  %v219_v26 = vld [vmem:[%s611_s3 + $0x18] sm:$0xff]  ;;  %v218_v27 = vld [vmem:[%s611_s3 + $0x10] sm:$0xff]  ;;  %v217_v28 = vld [vmem:[%s611_s3 + $0x8] sm:$0xff] }
  0x10   :  { %391 = vmatprep.subr.mxu1 %v27_v8  ;;  %418 = vmatpush3.msra.mxu0 %v226_v19  ;;  %v216_v29 = vld [vmem:[%s611_s3] sm:$0xff]  ;;  %v215_v49 = vld [vmem:[#allocation2 + $0x8] sm:$0xff]  ;;  %s477_s3 = smov [#allocation3]  }
  0x11   :  { %392 = vmatpush3.msra.mxu1 %v27_v8  ;;  %419 = vmatprep.subr.mxu0 %v225_v20  ;;  %v214_v51 = vld [vmem:[#allocation2] sm:$0xff]  ;;  %s326_s18 = sshll.u32 %s477_s3, 4  ;;  %s327_s18 = int_to_ptr.vmem [resolvable:$true] %s326_s18 }
  0x12   :  { %394 = vmatmul.mubr.msk.f32.vlgmr.msra.gmra.mxu1 %vm22_vm0, %v26_v9  ;;  %396 = vmatprep.subr.mxu1 %v124_v10  ;;  %s454_s19 = scalar_lea.vmem %s327_s18, 256  ;;  %p459_p1 = scmp.lt.s32.totalorder %s327_s18, %s327_s18 }
  0x13   :  { %397 = vmatpush3.msra.mxu1 %v124_v10  ;;  %412 = vmatprep.mubr.msk.f32.mxu1 %vm22_vm0, %v25_v3  ;;  %p455_p0 = scmp.ne.s32.totalorder %s327_s18, %s454_s19  ;;  %p460_p2 = scmp.lt.s32.totalorder %s454_s19, %s454_s19 }
  0x14   :  { %398 = vmatprep.subr.mxu1 %v123_v11  ;;  %420 = vmatpush3.msra.mxu0 %v225_v20 }
  0x15   :  { %399 = vmatpush3.msra.mxu1 %v123_v11  ;;  %421 = vmatprep.subr.mxu0 %v224_v21  ;;  %p461_p3 = por %p460_p2, %p459_p1 }
  0x16   :  { %400 = vmatprep.subr.mxu1 %v122_v12  ;;  %422 = vmatpush3.msra.mxu0 %v224_v21 }
  0x17   :  { %401 = vmatpush3.msra.mxu1 %v122_v12  ;;  %423 = vmatprep.subr.mxu0 %v223_v22  ;;  %p462_p4 = pnand %p461_p3, %p455_p0 }
  0x18   :  { %402 = vmatprep.subr.mxu1 %v121_v13  ;;  %424 = vmatpush3.msra.mxu0 %v223_v22 }
  0x19   :  { %403 = vmatpush3.msra.mxu1 %v121_v13  ;;  %425 = vmatprep.subr.mxu0 %v222_v23 }
  0x1a   :  { %404 = vmatprep.subr.mxu1 %v120_v14  ;;  %426 = vmatpush3.msra.mxu0 %v222_v23 }
  0x1b   :  { %405 = vmatpush3.msra.mxu1 %v120_v14  ;;  %427 = vmatprep.subr.mxu0 %v221_v24 }
  0x1c   :  { %406 = vmatprep.subr.mxu1 %v119_v15  ;;  %428 = vmatpush3.msra.mxu0 %v221_v24 }
  0x1d   :  { %407 = vmatpush3.msra.mxu1 %v119_v15  ;;  %429 = vmatprep.subr.mxu0 %v220_v25 }
  0x1e   :  { %408 = vmatprep.subr.mxu1 %v118_v16  ;;  %430 = vmatpush3.msra.mxu0 %v220_v25 }
  0x1f   :  { %409 = vmatpush3.msra.mxu1 %v118_v16  ;;  %431 = vmatprep.subr.mxu0 %v219_v26 }
  0x20   :  { %410 = vmatprep.subr.mxu1 %v117_v17  ;;  %432 = vmatpush3.msra.mxu0 %v219_v26 }
  0x21   :  { %411 = vmatpush3.msra.mxu1 %v117_v17  ;;  %433 = vmatprep.subr.mxu0 %v218_v27 }
  0x22   :  { %413 = vmatmul.mubr.msk.f32.vlgmr.msra.gmra.mxu1 %vm22_vm0, %v26_v9  ;;  %434 = vmatpush3.msra.mxu0 %v218_v27 }
  0x23   :  { %435 = vmatprep.subr.mxu0 %v217_v28 }
  0x24   :  { %436 = vmatpush3.msra.mxu0 %v217_v28 }
  0x25   :  { %437 = vmatprep.subr.mxu0 %v216_v29 }
  0x26   :  { %438 = vmatpush3.msra.mxu0 %v216_v29 }
  0xd2   :  { %v395_v31 = vpop.f32.mrf.mxu1 }
  0xd3   :  { %v201_v32 = vsub.f32 0.0, %v395_v31 }
  0xd4   :  { %v108_v33 = vpop.f32.mrf.mxu1 }
  0xd5   :  { %v204_v34 = vmul.f32 1.442695, %v201_v32  ;;  %v200_v35 = vsub.f32 0.0, %v108_v33 }
  0xd7   :  { %446 = vpow2.f32 %v204_v34  ;;  %v202_v36 = vmul.f32 1.442695, %v200_v35 }
  0xd9   :  { %448 = vpow2.f32 %v202_v36 }
  0xe2   :  { %v414_v42 = vpop.f32.mrf.mxu1 }
  0xe4   :  { %v447_v37 = vpop.eup %446  ;;  %v191_v46 = vpop.f32.mrf.mxu1 }
  0xe5   :  { %v207_v38 = vadd.f32 1.0, %v447_v37 }
  0xe6   :  { %v449_v39 = vpop.eup %448 }
  0xe7   :  { %450 = vrcp.f32 %v207_v38  ;;  %v206_v40 = vadd.f32 1.0, %v449_v39 }
  0xe9   :  { %452 = vrcp.f32 %v206_v40 }
  0xf4   :  { %v451_v41 = vpop.eup %450 }
  0xf5   :  { %v211_v44 = vmul.f32 %v451_v41, %v395_v31 }
  0xf6   :  { %v453_v43 = vpop.eup %452 }
  0xf7   :  { %v210_v45 = vmul.f32 %v453_v43, %v108_v33  ;;  %v213_v48 = vmul.f32 %v414_v42, %v211_v44 }
  0xf9   :  { %v212_v47 = vmul.f32 %v210_v45, %v191_v46 }
  0xfb   :  { %439 = vmatprep.mubr.msk.f32.mxu0 %vm228_vm1, %v212_v47 }
  0xfc   :  { %440 = vmatmul.mubr.msk.f32.vlgmr.msra.gmra.mxu0 %vm228_vm1, %v213_v48 }
 0x1bc   :  { %v441_v50 = vpop.f32.mrf.mxu0 }
 0x1bd   :  { %v311_v52 = vadd.f32 %v441_v50, %v215_v49 }
 0x1be   :  { %v301_v53 = vpop.f32.mrf.mxu0 }
 0x1bf   :  { %313 = vst.msk [vmem:[#allocation2 + $0x8] sm:$0xff] %vm22_vm0, %v311_v52  ;;  %v310_v54 = vadd.f32 %v301_v53, %v214_v51 }
 0x1c1   :  { %312 = vst.msk [vmem:[#allocation2] sm:$0xff] %vm22_vm0, %v310_v54 }
 0x1c6   :  { %v318_v55 = vld [vmem:[#allocation2 + $0x8] sm:$0xff] }
 0x1c7   :  { %320 = vst.msk [vmem:[#allocation3 + $0x8] sm:$0xff] %vm22_vm0, %v318_v55 }
 0x1c8   :  { %v317_v56 = vld [vmem:[#allocation2] sm:$0xff] }
 0x1c9   :  { %319 = vst.msk [vmem:[#allocation3] sm:$0xff] %vm22_vm0, %v317_v56 }
 0x1ca   :  { %465 = shalt.err (!%p462_p4)
}
 0x1cb   :  { %s478_s20 = smov 128   ;;  %s479_s21 = smov 8  }
 0x1cc   :  { %332 = dma.vmem_to_hbm [thread:$0]  %s327_s18, 256, %s612_s4, [#allocation4], %s478_s20, %s478_s20, %s479_s21  }
 0x1cd   :  { %474 = dma.done.wait [#allocation4], 256  }
 0x1ce   :  { %475 = vsyncadd [#allocation4], 4294967040 }
 0x1cf   :  { %336 = vsyncpa [#allocation4], 1 }

</bundles_post_ra>
